<compile_context>
chip_gen: v6e
topology: v6e:2x2x1
jax: 0.10.0
libtpu: 0.0.40
codegen_flags: <defaults>
</compile_context>

<pallas_src>
import functools

import jax
import jax.numpy as jnp
from jax.experimental import pallas as pl
from jax.experimental.pallas import tpu as pltpu


_MAX_TILE = 4096                       # widest spatial tile we use
_TILE_CANDIDATES = (4096, 2048, 1024, 512)   # lane-dense, >= 512 per review


def _cdiv(a, b):
    return -(-a // b)


def _round_up(a, b):
    return _cdiv(a, b) * b


def _vmem_capacity_bytes():
    """Per-core VMEM capacity; conservative fallback if the query fails."""
    try:
        return int(pltpu.get_tpu_info().vmem_capacity_bytes)
    except Exception:
        return 64 * 1024 * 1024        # v7x per-TensorCore size (most restrictive)


# -----------------------------------------------------------------------------
# Unified streamed kernel.  grid = (N, 2*num_tiles).
#   j <  num_tiles : reduce phase  (accumulate sum / max, optionally stash tile)
#   j >= num_tiles : apply phase   (multiply by sigmoid(MLP), write output tile)
# -----------------------------------------------------------------------------
def _ca_kernel(num_tiles, tile_hw, hw_total, ragged, use_stash,
               x_ref, w1_ref, w2_ref, o_ref,
               sum_sc, max_sc, attn_sc, stash_sc=None):
    j = pl.program_id(1)

    @pl.when(j == 0)
    def _():
        sum_sc[...] = jnp.zeros_like(sum_sc)
        max_sc[...] = jnp.full_like(max_sc, -jnp.inf)

    @pl.when(j < num_tiles)
    def _():
        x = x_ref[0]                                   # (C, tile_hw), native dtype
        if use_stash:
            stash_sc[j] = x                            # persistent copy for the apply phase
        if ragged:
            # Mask the padded columns of the (partial) last tile out of the pooling.
            valid = (jax.lax.broadcasted_iota(jnp.int32, x.shape, 1)
                     < (hw_total - j * tile_hw))
            xs = jnp.where(valid, x, jnp.zeros_like(x))
            xm = jnp.where(valid, x, jnp.full_like(x, -jnp.inf))
        else:
            xs, xm = x, x
        sum_sc[...] += jnp.sum(xs, axis=-1, keepdims=True, dtype=jnp.float32)
        max_sc[...] = jnp.maximum(
            max_sc[...], jnp.max(xm, axis=-1, keepdims=True).astype(jnp.float32))

    @pl.when(j == num_tiles - 1)
    def _():
        # Shared MLP: both pooled branches stacked into one (C, 2) operand.
        avg = sum_sc[...] * (1.0 / float(hw_total))             # (C, 1)
        pooled = jnp.concatenate([avg, max_sc[...]], axis=1)    # (C, 2)
        h = jnp.maximum(
            jnp.dot(w1_ref[...], pooled, preferred_element_type=jnp.float32), 0.0)
        a = jnp.dot(w2_ref[...], h, preferred_element_type=jnp.float32)   # (C, 2)
        attn_sc[...] = jax.nn.sigmoid(jnp.sum(a, axis=1, keepdims=True))  # (C, 1)

    @pl.when(j >= num_tiles)
    def _():
        xt = stash_sc[j - num_tiles] if use_stash else x_ref[0]
        o_ref[0] = (xt * attn_sc[...].astype(xt.dtype)).astype(o_ref.dtype)


# -----------------------------------------------------------------------------
# Plan selection: pick (tile_hw, use_stash) from the per-generation VMEM budget.
# -----------------------------------------------------------------------------
def _choose_plan(hw, c, itemsize, budget_bytes, fixed_bytes):
    c_pad = _round_up(max(c, 1), 8)

    def stream_bytes(t):          # double-buffered input + output tiles
        return 4 * c_pad * _round_up(t, 128) * itemsize

    def slab_bytes(t):            # persistent in-VMEM copy of one image
        return c_pad * _cdiv(hw, t) * _round_up(t, 128) * itemsize

    # (a) whole image as one tile: 1 read + 1 write, no slab, no ragged mask.
    if hw <= _MAX_TILE and stream_bytes(hw) + fixed_bytes <= budget_bytes:
        return hw, False
    # (b) streamed tiles + VMEM stash slab: still 1 read + 1 write.
    for t in _TILE_CANDIDATES:
        if t < hw and slab_bytes(t) + stream_bytes(t) + fixed_bytes <= budget_bytes:
            return t, True
    # (c) 2-read re-stream fallback (only for extreme C * HW footprints).
    for t in _TILE_CANDIDATES + (256, 128):
        if t < hw and stream_bytes(t) + fixed_bytes <= budget_bytes:
            return t, False
    # TODO(synk): tile the channel axis too for extreme C; for now take the
    # smallest lane tile and let vmem_limit_bytes absorb the overshoot.
    return (hw if hw <= 128 else 128), False


# -----------------------------------------------------------------------------
# Wrapper
# -----------------------------------------------------------------------------
def ca_module(x, w1, w2, *, tile_hw=None, use_stash=None):
    """Channel attention forward. x: (N, C, H, W) NCHW; returns same shape/dtype.

    w1: (C//r, C)  first 1x1 conv weight (no bias)
    w2: (C, C//r)  second 1x1 conv weight (no bias)
    tile_hw / use_stash override the auto-chosen plan (testing / tuning only).
    """
    N, C, H, W = x.shape
    HW = H * W
    Cr = w1.shape[0]
    itemsize = jnp.dtype(x.dtype).itemsize

    # Pre-cast the tiny MLP weights once, outside the kernel body.
    w1f = w1.astype(jnp.float32)
    w2f = w2.astype(jnp.float32)

    c_pad = _round_up(max(C, 1), 8)
    cr_pad = _round_up(max(Cr, 1), 8)
    weight_bytes = 2 * (cr_pad * _round_up(C, 128) + c_pad * _round_up(Cr, 128)) * 4
    small_scratch_bytes = 3 * c_pad * 128 * 4
    fixed_bytes = weight_bytes + small_scratch_bytes

    vmem_cap = _vmem_capacity_bytes()
    budget = (vmem_cap * 3) // 4           # ~48 MiB on v7x, ~96 MiB on v5e/v6e

    auto_tile, auto_stash = _choose_plan(HW, C, itemsize, budget, fixed_bytes)
    thw = auto_tile if tile_hw is None else min(int(tile_hw), HW)
    if thw != HW and thw % 128 != 0:
        raise ValueError("tile_hw must be a multiple of 128 or cover H*W")
    num_tiles = _cdiv(HW, thw)
    stash = auto_stash if use_stash is None else bool(use_stash)
    if num_tiles == 1:
        stash = False                      # the resident block already serves the apply step
    ragged = (HW % thw) != 0

    # Explicit scoped-VMEM limit from the actual footprint (+ headroom); the
    # default scoped limits (16 MiB v5e / 32 MiB v6e,v7x) must not bind.
    footprint = fixed_bytes + 4 * c_pad * _round_up(thw, 128) * itemsize
    if stash:
        footprint += c_pad * num_tiles * _round_up(thw, 128) * itemsize
    vmem_limit = int(min(vmem_cap,
                         max(32 * 1024 * 1024,
                             footprint * 5 // 4 + 4 * 1024 * 1024)))

    x_flat = x.reshape(N, C, HW)

    if stash:
        # Apply phase keeps the last reduce tile's block index -> no second HBM read.
        x_index_map = lambda n, j: (n, 0, jnp.minimum(j, num_tiles - 1))
    else:
        # Fallback: re-stream tiles in the apply phase (2 reads total).
        x_index_map = lambda n, j: (n, 0, j % num_tiles)

    scratch_shapes = [
        pltpu.VMEM((C, 1), jnp.float32),   # running sum
        pltpu.VMEM((C, 1), jnp.float32),   # running max
        pltpu.VMEM((C, 1), jnp.float32),   # sigmoid(MLP) attention
    ]
    if stash:
        scratch_shapes.append(pltpu.VMEM((num_tiles, C, thw), x.dtype))

    reads = 1 if (stash or num_tiles == 1) else 2
    cost = pl.CostEstimate(
        flops=3 * N * C * HW + 8 * N * C * Cr,
        transcendentals=N * C,
        bytes_accessed=(reads + 1) * N * C * HW * itemsize + weight_bytes,
    )

    kernel = functools.partial(_ca_kernel, num_tiles, thw, HW, ragged, stash)

    # TODO(synk): on v7x with N == 1 both TensorCores could split the tile axis
    # (per-core partial sum/max combined via CMEM); batch-only megacore
    # parallelism leaves one core idle in that case.
    out_flat = pl.pallas_call(
        kernel,
        out_shape=jax.ShapeDtypeStruct((N, C, HW), x.dtype),
        grid_spec=pltpu.PrefetchScalarGridSpec(
            num_scalar_prefetch=0,
            grid=(N, 2 * num_tiles),
            in_specs=[
                pl.BlockSpec((1, C, thw), x_index_map),
                pl.BlockSpec((Cr, C), lambda n, j: (0, 0)),
                pl.BlockSpec((C, Cr), lambda n, j: (0, 0)),
            ],
            # Reduce phase never writes; hold output block 0 resident until the
            # first apply step so each output tile is flushed to HBM exactly once.
            out_specs=pl.BlockSpec(
                (1, C, thw), lambda n, j: (n, 0, jnp.maximum(j - num_tiles, 0))),
            scratch_shapes=scratch_shapes,
        ),
        compiler_params=pltpu.CompilerParams(
            dimension_semantics=("parallel", "arbitrary"),
            vmem_limit_bytes=vmem_limit),
        cost_estimate=cost,
    )(x_flat, w1f, w2f)
    return out_flat.reshape(N, C, H, W)


# -----------------------------------------------------------------------------
# Pure-JAX reference matching the PyTorch forward exactly.
# -----------------------------------------------------------------------------
def ca_reference(x, w1, w2):
    N, C, H, W = x.shape
    xf = x.reshape(N, C, H * W).astype(jnp.float32)
    avg = jnp.mean(xf, axis=-1)
    mx = jnp.max(xf, axis=-1)
    w1f = w1.astype(jnp.float32)
    w2f = w2.astype(jnp.float32)

    def mlp(p):
        h = jnp.maximum(p @ w1f.T, 0.0)
        return h @ w2f.T

    attn = jax.nn.sigmoid(mlp(avg) + mlp(mx))
    return (x * attn[:, :, None, None].astype(x.dtype)).astype(x.dtype)


if __name__ == "__main__":
    # Small shapes consistent with the module: channels=4, reduction=2.
    N, C, H, W = 2, 4, 16, 16
    reduction = 2
    Cr = C // reduction

    key = jax.random.PRNGKey(0)
    kx, kw1, kw2, kx2 = jax.random.split(key, 4)

    x = jax.random.normal(kx, (N, C, H, W), dtype=jnp.float32)
    # Conv2d 1x1 (no bias) weights, stored as matrices:
    #   shared_mlp[0].weight : (C//r, C, 1, 1) -> (C//r, C)
    #   shared_mlp[2].weight : (C, C//r, 1, 1) -> (C, C//r)
    w1 = jax.random.normal(kw1, (Cr, C), dtype=jnp.float32) * 0.5
    w2 = jax.random.normal(kw2, (C, Cr), dtype=jnp.float32) * 0.5

    ref = ca_reference(x, w1, w2)

    # Auto plan (single resident block; 1 HBM read + 1 write).
    out = jax.block_until_ready(ca_module(x, w1, w2))
    assert out.shape == x.shape and out.dtype == x.dtype
    assert jnp.allclose(out, ref, atol=1e-5, rtol=1e-5), "auto-plan mismatch"

    # Streamed stash path (tiled reduce + apply-from-VMEM-slab; still 1 read).
    out_stash = jax.block_until_ready(
        ca_module(x, w1, w2, tile_hw=128, use_stash=True))
    assert jnp.allclose(out_stash, ref, atol=1e-5, rtol=1e-5), "stash mismatch"

    # Two-phase re-read fallback.
    out_2p = jax.block_until_ready(
        ca_module(x, w1, w2, tile_hw=128, use_stash=False))
    assert jnp.allclose(out_2p, ref, atol=1e-5, rtol=1e-5), "two-phase mismatch"

    # Ragged spatial extent (14*14 = 196 has no 128-multiple divisor).
    xr = jax.random.normal(kx2, (N, C, 14, 14), dtype=jnp.float32)
    ref_r = ca_reference(xr, w1, w2)
    out_r = jax.block_until_ready(
        ca_module(xr, w1, w2, tile_hw=128, use_stash=True))
    assert jnp.allclose(out_r, ref_r, atol=1e-5, rtol=1e-5), "ragged stash mismatch"
    out_r2 = jax.block_until_ready(
        ca_module(xr, w1, w2, tile_hw=128, use_stash=False))
    assert jnp.allclose(out_r2, ref_r, atol=1e-5, rtol=1e-5), "ragged two-phase mismatch"

    print("KERNEL_OK")
</pallas_src>

<mosaic_0001>
module attributes {stable_mosaic.version = 11 : i64} {
  func.func @_ca_kernel(%arg0: i32, %arg1: i32, %arg2: memref<1x4x256xf32, #tpu.memory_space<vmem>>, %arg3: memref<2x4xf32, #tpu.memory_space<vmem>>, %arg4: memref<4x2xf32, #tpu.memory_space<vmem>>, %arg5: memref<1x4x256xf32, #tpu.memory_space<vmem>>, %arg6: memref<4x1xf32, #tpu.memory_space<vmem>>, %arg7: memref<4x1xf32, #tpu.memory_space<vmem>>, %arg8: memref<4x1xf32, #tpu.memory_space<vmem>>) attributes {dimension_semantics = [#tpu.dimension_semantics<parallel>, #tpu.dimension_semantics<arbitrary>], iteration_bounds = array<i64: 2, 2>, scalar_prefetch = 0 : i64, scratch_operands = 3 : i64, tpu.core_type = #tpu.core_type<tc>, window_params = [{transform_indices = @transform_0, window_bounds = array<i64: 1, 4, 256>}, {pipeline_mode = #tpu.pipeline_mode<synchronous>, transform_indices = @transform_1, window_bounds = array<i64: 2, 4>}, {pipeline_mode = #tpu.pipeline_mode<synchronous>, transform_indices = @transform_2, window_bounds = array<i64: 4, 2>}, {transform_indices = @transform_3, window_bounds = array<i64: 1, 4, 256>}]} {
    %c0_i32 = arith.constant 0 : i32
    %0 = arith.cmpi eq, %arg1, %c0_i32 : i32
    %1 = arith.extui %0 : i1 to i32
    %c0_i32_0 = arith.constant 0 : i32
    %2 = arith.cmpi ne, %1, %c0_i32_0 : i32
    scf.if %2 {
      %cst = arith.constant 0.000000e+00 : f32
      %12 = vector.broadcast %cst : f32 to vector<4x1xf32>
      %c0 = arith.constant 0 : index
      %c0_6 = arith.constant 0 : index
      %13 = vector.load %arg6[%c0, %c0_6] : memref<4x1xf32, #tpu.memory_space<vmem>>, vector<4x1xf32>
      tpu.vector_store %arg6[%c0, %c0_6], %12 {strides = array<i32>} : memref<4x1xf32, #tpu.memory_space<vmem>>, vector<4x1xf32>,
      %cst_7 = arith.constant 0xFF800000 : f32
      %14 = vector.broadcast %cst_7 : f32 to vector<4x1xf32>
      %c0_8 = arith.constant 0 : index
      %c0_9 = arith.constant 0 : index
      %15 = vector.load %arg7[%c0_8, %c0_9] : memref<4x1xf32, #tpu.memory_space<vmem>>, vector<4x1xf32>
      tpu.vector_store %arg7[%c0_8, %c0_9], %14 {strides = array<i32>} : memref<4x1xf32, #tpu.memory_space<vmem>>, vector<4x1xf32>,
    } else {
    }
    %c1_i32 = arith.constant 1 : i32
    %3 = arith.cmpi slt, %arg1, %c1_i32 : i32
    %4 = arith.extui %3 : i1 to i32
    %c0_i32_1 = arith.constant 0 : i32
    %5 = arith.cmpi ne, %4, %c0_i32_1 : i32
    scf.if %5 {
      %c0 = arith.constant 0 : index
      %c0_6 = arith.constant 0 : index
      %c0_7 = arith.constant 0 : index
      %12 = vector.load %arg2[%c0, %c0_6, %c0_7] : memref<1x4x256xf32, #tpu.memory_space<vmem>>, vector<1x4x256xf32>
      %13 = vector.shape_cast %12 : vector<1x4x256xf32> to vector<4x256xf32>
      %c0_8 = arith.constant 0 : index
      %c0_9 = arith.constant 0 : index
      %14 = vector.load %arg6[%c0_8, %c0_9] : memref<4x1xf32, #tpu.memory_space<vmem>>, vector<4x1xf32>
      %cst = arith.constant dense<0.000000e+00> : vector<4xf32>
      %15 = vector.multi_reduction <add>, %13, %cst [1] : vector<4x256xf32> to vector<4xf32>
      %16 = vector.shape_cast %15 : vector<4xf32> to vector<4x1xf32>
      %17 = arith.addf %14, %16 : vector<4x1xf32>
      %c0_10 = arith.constant 0 : index
      %c0_11 = arith.constant 0 : index
      %18 = vector.load %arg6[%c0_10, %c0_11] : memref<4x1xf32, #tpu.memory_space<vmem>>, vector<4x1xf32>
      tpu.vector_store %arg6[%c0_10, %c0_11], %17 {strides = array<i32>} : memref<4x1xf32, #tpu.memory_space<vmem>>, vector<4x1xf32>,
      %c0_12 = arith.constant 0 : index
      %c0_13 = arith.constant 0 : index
      %19 = vector.load %arg7[%c0_12, %c0_13] : memref<4x1xf32, #tpu.memory_space<vmem>>, vector<4x1xf32>
      %cst_14 = arith.constant dense<0xFF800000> : vector<4xf32>
      %20 = vector.multi_reduction <maximumf>, %13, %cst_14 [1] : vector<4x256xf32> to vector<4xf32>
      %21 = vector.shape_cast %20 : vector<4xf32> to vector<4x1xf32>
      %22 = arith.maximumf %19, %21 : vector<4x1xf32>
      %c0_15 = arith.constant 0 : index
      %c0_16 = arith.constant 0 : index
      %23 = vector.load %arg7[%c0_15, %c0_16] : memref<4x1xf32, #tpu.memory_space<vmem>>, vector<4x1xf32>
      tpu.vector_store %arg7[%c0_15, %c0_16], %22 {strides = array<i32>} : memref<4x1xf32, #tpu.memory_space<vmem>>, vector<4x1xf32>,
    } else {
    }
    %c0_i32_2 = arith.constant 0 : i32
    %6 = arith.cmpi eq, %arg1, %c0_i32_2 : i32
    %7 = arith.extui %6 : i1 to i32
    %c0_i32_3 = arith.constant 0 : i32
    %8 = arith.cmpi ne, %7, %c0_i32_3 : i32
    scf.if %8 {
      %c0 = arith.constant 0 : index
      %c0_6 = arith.constant 0 : index
      %12 = vector.load %arg6[%c0, %c0_6] : memref<4x1xf32, #tpu.memory_space<vmem>>, vector<4x1xf32>
      %cst = arith.constant 3.906250e-03 : f32
      %13 = vector.broadcast %cst : f32 to vector<4x1xf32>
      %14 = arith.mulf %12, %13 : vector<4x1xf32>
      %c0_7 = arith.constant 0 : index
      %c0_8 = arith.constant 0 : index
      %15 = vector.load %arg7[%c0_7, %c0_8] : memref<4x1xf32, #tpu.memory_space<vmem>>, vector<4x1xf32>
      %16 = tpu.concatenate %14, %15 in 1 : vector<4x1xf32>, vector<4x1xf32> -> vector<4x2xf32>
      %c0_9 = arith.constant 0 : index
      %c0_10 = arith.constant 0 : index
      %17 = vector.load %arg3[%c0_9, %c0_10] : memref<2x4xf32, #tpu.memory_space<vmem>>, vector<2x4xf32>
      %cst_11 = arith.constant dense<0.000000e+00> : vector<2x2xf32>
      %18 = tpu.matmul %17, %16, %cst_11 {dimension_numbers = #tpu.dot_dimension_numbers<[1], [0], [0], [1], [0, 0, 1, 1], [], []>} : vector<2x4xf32>, vector<4x2xf32>, vector<2x2xf32> -> vector<2x2xf32>
      %cst_12 = arith.constant 0.000000e+00 : f32
      %19 = vector.broadcast %cst_12 : f32 to vector<2x2xf32>
      %20 = arith.maximumf %18, %19 : vector<2x2xf32>
      %c0_13 = arith.constant 0 : index
      %c0_14 = arith.constant 0 : index
      %21 = vector.load %arg4[%c0_13, %c0_14] : memref<4x2xf32, #tpu.memory_space<vmem>>, vector<4x2xf32>
      %cst_15 = arith.constant dense<0.000000e+00> : vector<4x2xf32>
      %22 = tpu.matmul %21, %20, %cst_15 {dimension_numbers = #tpu.dot_dimension_numbers<[1], [0], [0], [1], [0, 0, 1, 1], [], []>} : vector<4x2xf32>, vector<2x2xf32>, vector<4x2xf32> -> vector<4x2xf32>
      %cst_16 = arith.constant dense<0.000000e+00> : vector<4xf32>
      %23 = vector.multi_reduction <add>, %22, %cst_16 [1] : vector<4x2xf32> to vector<4xf32>
      %24 = vector.shape_cast %23 : vector<4xf32> to vector<4x1xf32>
      %25 = arith.negf %24 : vector<4x1xf32>
      %26 = math.exp %25 : vector<4x1xf32>
      %cst_17 = arith.constant 1.000000e+00 : f32
      %27 = vector.broadcast %cst_17 : f32 to vector<4x1xf32>
      %28 = arith.addf %27, %26 : vector<4x1xf32>
      %29 = arith.divf %27, %28 : vector<4x1xf32>
      %c0_18 = arith.constant 0 : index
      %c0_19 = arith.constant 0 : index
      %30 = vector.load %arg8[%c0_18, %c0_19] : memref<4x1xf32, #tpu.memory_space<vmem>>, vector<4x1xf32>
      tpu.vector_store %arg8[%c0_18, %c0_19], %29 {strides = array<i32>} : memref<4x1xf32, #tpu.memory_space<vmem>>, vector<4x1xf32>,
    } else {
    }
    %c1_i32_4 = arith.constant 1 : i32
    %9 = arith.cmpi sge, %arg1, %c1_i32_4 : i32
    %10 = arith.extui %9 : i1 to i32
    %c0_i32_5 = arith.constant 0 : i32
    %11 = arith.cmpi ne, %10, %c0_i32_5 : i32
    scf.if %11 {
      %c0 = arith.constant 0 : index
      %c0_6 = arith.constant 0 : index
      %c0_7 = arith.constant 0 : index
      %12 = vector.load %arg2[%c0, %c0_6, %c0_7] : memref<1x4x256xf32, #tpu.memory_space<vmem>>, vector<1x4x256xf32>
      %13 = vector.shape_cast %12 : vector<1x4x256xf32> to vector<4x256xf32>
      %c0_8 = arith.constant 0 : index
      %c0_9 = arith.constant 0 : index
      %14 = vector.load %arg8[%c0_8, %c0_9] : memref<4x1xf32, #tpu.memory_space<vmem>>, vector<4x1xf32>
      %15 = vector.broadcast %14 : vector<4x1xf32> to vector<4x256xf32>
      %16 = arith.mulf %13, %15 : vector<4x256xf32>
      %c0_10 = arith.constant 0 : index
      %c0_11 = arith.constant 0 : index
      %c0_12 = arith.constant 0 : index
      %17 = vector.load %arg5[%c0_10, %c0_11, %c0_12] : memref<1x4x256xf32, #tpu.memory_space<vmem>>, vector<1x4x256xf32>
      %18 = vector.shape_cast %17 : vector<1x4x256xf32> to vector<4x256xf32>
      %19 = vector.shape_cast %16 : vector<4x256xf32> to vector<1x4x256xf32>
      tpu.vector_store %arg5[%c0_10, %c0_11, %c0_12], %19 {strides = array<i32>} : memref<1x4x256xf32, #tpu.memory_space<vmem>>, vector<1x4x256xf32>,
    } else {
    }
    return
  }
  func.func @transform_0(%arg0: i32, %arg1: i32) -> (i32, i32, i32) {
    %c1_i32 = arith.constant 1 : i32
    %c0_i32 = arith.constant 0 : i32
    %0 = arith.cmpi eq, %c1_i32, %c0_i32 : i32
    %c1_i32_0 = arith.constant 1 : i32
    %1 = arith.select %0, %c1_i32_0, %c1_i32 : i32
    %2 = arith.remsi %arg1, %1 : i32
    %c0_i32_1 = arith.constant 0 : i32
    %3 = arith.cmpi ne, %2, %c0_i32_1 : i32
    %c0_i32_2 = arith.constant 0 : i32
    %4 = arith.cmpi slt, %2, %c0_i32_2 : i32
    %c0_i32_3 = arith.constant 0 : i32
    %5 = arith.cmpi slt, %1, %c0_i32_3 : i32
    %6 = arith.xori %4, %5 : i1
    %7 = arith.andi %6, %3 : i1
    %8 = arith.addi %2, %1 : i32
    %9 = arith.select %7, %8, %2 : i32
    %c0_i32_4 = arith.constant 0 : i32
    %c0_i32_5 = arith.constant 0 : i32
    return %arg0, %c0_i32_4, %9 : i32, i32, i32
  }
  func.func @transform_1(%arg0: i32, %arg1: i32) -> (i32, i32) {
    %c0_i32 = arith.constant 0 : i32
    %c0_i32_0 = arith.constant 0 : i32
    %c0_i32_1 = arith.constant 0 : i32
    return %c0_i32, %c0_i32_0 : i32, i32
  }
  func.func @transform_2(%arg0: i32, %arg1: i32) -> (i32, i32) {
    %c0_i32 = arith.constant 0 : i32
    %c0_i32_0 = arith.constant 0 : i32
    %c0_i32_1 = arith.constant 0 : i32
    return %c0_i32, %c0_i32_0 : i32, i32
  }
  func.func @transform_3(%arg0: i32, %arg1: i32) -> (i32, i32, i32) {
    %c1_i32 = arith.constant 1 : i32
    %0 = arith.subi %arg1, %c1_i32 : i32
    %c0_i32 = arith.constant 0 : i32
    %1 = arith.maxsi %0, %c0_i32 : i32
    %c0_i32_0 = arith.constant 0 : i32
    %c0_i32_1 = arith.constant 0 : i32
    return %arg0, %c0_i32_0, %1 : i32, i32, i32
  }
}

</mosaic_0001>

<bundles_post_ra>
// kernel: tpu_custom_call.1
= control target key start
LH: loop header
LB: loop body
LE: loop exit
PB: predicated region body
PF: predicated region fallthrough
CT: control target
= control target key end

     0   :  { %s1097_s0 = inlined_call_operand.hbm [shape: f32[2,4,256], index: 0, kind: input, shape index: {}]   ;;  %s1098_s1 = inlined_call_operand.vmem [shape: f32[2,4], index: 1, kind: input, shape index: {}]   ;;  %s1099_s2 = inlined_call_operand.vmem [shape: f32[4,2], index: 2, kind: input, shape index: {}]   ;;  %s1100_s3 = inlined_call_operand.hbm [shape: f32[2,4,256], index: 3, kind: output, shape index: {}]  }
   0x1   :  { %1102 = sst [smem:[#allocation13_spill]] %s1097_s0 }
   0x2   :  { %8 = vsyncpa [#allocation6], 0 }
   0x3   :  { %10 = vsyncpa [#allocation6 + $0x1], 0 }
   0x4   :  { %11 = vsyncpa [#allocation7], 0 }
   0x5   :  { %13 = vsyncpa [#allocation7 + $0x1], 0  ;;  %s888_s12 = smov 0   ;;  %s890_s13 = smov 0  }
   0x6   :  { %s892_s14 = smov 0   ;;  %s894_s15 = smov 0  }
   0x7   :  { %s896_s16 = smov 0   ;;  %s898_s17 = smov 0  }
   0x8   :  { %s900_s18 = smov 0   ;;  %s902_s19 = smov 0  }
   0x9   :  { %s904_s20 = smov 0   ;;  %s906_s21 = smov 0  }
   0xa   :  { %s908_s22 = smov 0  }
   0xb LB: > { %s551_s23 = sadd.s32 4294967295, %s857_s22   ;;  %s552_s24 = sadd.s32 4294967294, %s857_s22   ;;  %s857_s22 = sphi %s908_s22, %s19_s22   ;;  %s853_s21 = sphi %s906_s21, %s1123_s21   ;;  %s849_s20 = sphi %s904_s20, %s1122_s20   ;;  %s845_s19 = sphi %s902_s19, %s1121_s19   ;;  %s841_s18 = sphi %s900_s18, %s1120_s18   ;;  %s837_s17 = sphi %s898_s17, %s1119_s17   ;;  %s833_s16 = sphi %s896_s16, %s1118_s16   ;;  %s829_s15 = sphi %s894_s15, %s1117_s15   ;;  %s825_s14 = sphi %s892_s14, %s1116_s14   ;;  %s821_s13 = sphi %s890_s13, %s1115_s13   ;;  %s817_s12 = sphi %s888_s12, %s1114_s12  }
   0xc   : > { %s28_s25 = sadd.s32 1, %s849_s20  ;;  %s31_s26 = sadd.s32 1, %s853_s21 }
   0xd   : > { %p29_p0 = scmp.ge.s32.totalorder %s28_s25, 2  ;;  %s38_s27 = sadd.s32 1, %s837_s17 }
   0xe   : > { %p45_p1 = scmp.ne.s32.totalorder %s837_s17, %s833_s16  ;;  %p46_p2 = scmp.eq.s32.totalorder %s857_s22, 0 }
   0xf   : > { %s1125_s25 = smov (%p29_p0, %s28_s25), 0  ;;  %s1127_s26 = smov (!%p29_p0, %s31_s26), %s853_s21 }
  0x10   : > { %1103 = sst [smem:[#allocation11_spill]] %s1125_s25  ;;  %p952_p3 = por %p46_p2, %p45_p1 }
  0x11   : > { %p51_p4 = scmp.ne.s32.totalorder %s833_s16, %s829_s15  ;;  %p33_p5 = scmp.ge.s32.totalorder %s1127_s26, 2 }
  0x12   : > { %p52_p6 = scmp.eq.s32.totalorder %s551_s23, 0  ;;  %s114_s4 = sadd.s32 1, %s825_s14 }
  0x13   : > { %s1129_s26 = smov (%p33_p5, %s1127_s26), 0  ;;  %p124_p9 = scmp.ne.s32.totalorder %s825_s14, %s821_s13 }
  0x14   : > { %1105 = sst [smem:[#allocation12_spill]] %s1129_s26  ;;  %p959_p7 = por %p52_p6, %p51_p4 }
  0x15   : > { %s35_s30 = ssub.s32 %s853_s21, %s1129_s26  ;;  %p125_p10 = scmp.eq.s32.totalorder %s551_s23, 3 }
  0x16   : > { %p36_p8 = scmp.eq.s32.totalorder %s35_s30, 0  ;;  %p130_p11 = scmp.ne.s32.totalorder %s821_s13, %s817_s12 }
  0x17   : > { %p973_p12 = por %p125_p10, %p124_p9  ;;  %p131_p13 = scmp.eq.s32.totalorder %s552_s24, 3 }
  0x18   : > { %s967_s5 = scalar_select %p36_p8, %s837_s17, %s38_s27  }
  0x19   : > { %p606_p0 = scmp.lt.s32.totalorder %s857_s22, 4  ;;  %p981_p1 = por %p131_p13, %p130_p11 }
  0x1a   : > { %s979_s7 = scalar_select %p36_p8, %s825_s14, %s114_s4  }
  0x1b   : > { %s1108_s8 = scalar_select %p981_p1, 1, 0 }
  0x1c   : > { %s157_s9 = sand.u32 1, %s837_s17   ;;  %s579_s11 = sshll.u32 %s853_s21, 7 }
  0x1d   : > { %s557_s10 = sshll.u32 %s157_s9, 3  ;;  %s1109_s0 = sld [smem:[#allocation13_spill]] }
  0x1e   : > { %s161_s30 = scalar_lea.vmem [#allocation5], %s557_s10  ;;  %p992_p2 = pnand %p606_p0, %p952_p3 }
  0x1f   : > { %s169_s26 = sshll.u32 %s161_s30, 4  ;;  %p560_p4 = scmp.ge.s32.totalorder %s857_s22, 1  ;;  %s170_s26 = int_to_ptr.vmem [resolvable:$true] %s169_s26 }
  0x20   : > { %p174_p5 = scmp.lt.s32.totalorder %s857_s22, 5  ;;  %s158_s4 = scalar_lea.sflag [#allocation6], %s157_s9 }
  0x21   : > { %p711_p6 = pneg %p992_p2  ;;  %s722_s25 = scalar_lea.vmem %s170_s26, 128 }
  0x22   : > { %p723_p8 = scmp.ne.s32.totalorder %s170_s26, %s722_s25  ;;  %s859_s15 = smov [#allocation5]  }
  0x23   : > { %s167_s23 = scalar_lea.hbm %s1109_s0, %s579_s11  ;;  %s727_s11 = sshll.u32 %s859_s15, 4  ;;  %s728_s11 = int_to_ptr.vmem [resolvable:$false] %s727_s11 }
  0x24   : > { %p725_p9 = pnand %p723_p8, %p711_p6  ;;  %s729_s10 = scalar_lea.vmem %s728_s11, 256 }
  0x25   : > { %p730_p11 = scmp.lt.s32.totalorder %s170_s26, %s728_s11  ;;  %p731_p13 = scmp.lt.s32.totalorder %s729_s10, %s722_s25 }
  0x26   : > { %p726_p10 = pneg %p725_p9 }
  0x27   : > { %p732_p3 = por %p731_p13, %p730_p11 }
  0x29   : > { %p733_p0 = pnand %p732_p3, %p726_p10 }
  0x2b   : > { %736 = shalt.err (!%p733_p0)
}
  0x2c   : > { %601 = dma.hbm_to_vmem [thread:$0]  (!%p992_p2), %s167_s23, 128, %s170_s26, %s158_s4  }
  0x2d   : > { %p175_p1 = pnand %p560_p4, %p174_p5 }
  0x2e   : > { %s180_s28 = sand.u32 (!%p175_p1), 1, %s833_s16  }
  0x2f   : > { %178 = sbr.rel (%p175_p1) target bundleno = 1070 (0x42e), region = 32  ;;  %s1007_s9 = sshll.u32 (!%p175_p1), %s180_s28, 3 }
  0x30   : > { %s181_s27 = scalar_lea.sflag (!%p175_p1), [#allocation6], %s180_s28  ;;  %s184_s25 = scalar_lea.vmem (!%p175_p1), [#allocation5], %s1007_s9 }
  0x34   : > { %808 = dma.done.wait (%p959_p7), %s181_s27, 128  }
  0x35   : > { %810 = vsyncadd (%p959_p7), %s181_s27, 4294967168  ;;  %s204_s26 = sand.u32 1, %s821_s13   ;;  %p563_p1 = scmp.ne.s32.totalorder %s841_s18, 0 }
  0x36   : > { %s1017_s23 = sshll.u32 %s204_s26, 3 }
  0x37   : > { %s206_s30 = scalar_lea.vmem [#allocation8], %s1017_s23  ;;  %214 = sbr.rel (%p563_p1) target bundleno = 62 (0x3e), region = 40 }
  0x3c   : > { %vm215_vm0 = vcmask 3072   ;;  %v860_v0 = vmov 0.0   ;;  %v861_v1 = vmov -inf  }
  0x3d   : > { %216 = vst.msk [vmem:[#allocation2] sm:$0xf] %vm215_vm0, %v860_v0  ;;  %217 = vst.msk [vmem:[#allocation3] sm:$0xf] %vm215_vm0, %v861_v1 }
  0x3e PF: > { %p564_p7 = scmp.ge.s32.totalorder %s841_s18, 1 }
  0x40   : > { %221 = sbr.rel (%p564_p7) target bundleno = 220 (0xdc), region = 44 }
  0x45   : > { %v222_v2 = vld [vmem:[%s184_s25] sm:$0xff]  ;;  %vm227_vm1 = vcmask 1043456   ;;  %v223_v10 = vld [vmem:[#allocation2] sm:$0xf]  ;;  %vm234_vm2 = vcmask 3072  }
  0x46   : > { %v225_v3 = vcombine.high %v222_v2, %v222_v2  ;;  %v228_v4 = vsel %vm227_vm1, %v222_v2, 0.0  ;;  %v237_v6 = vsel %vm227_vm1, %v222_v2, -inf  ;;  %v236_v13 = vld [vmem:[#allocation3] sm:$0xf] }
  0x48   : > { %v229_v5 = vsel %vm227_vm1, %v225_v3, 0.0  ;;  %v238_v7 = vsel %vm227_vm1, %v225_v3, -inf }
  0x49   : > { %v230_v8 = vadd.f32 %v229_v5, %v228_v4  ;;  %v239_v9 = vmax.f32 %v237_v6, %v238_v7 }
  0x4b   : > { %231 = vadd.xlane.f32.xlu0 %v230_v8 }
  0x4f   : > { %240 = vmax.xlane.f32.xlu0 %v239_v9 }
  0xd4   : > { %v232_v11 = vpop.xlane.xlu0 %231 }
  0xd5   : > { %v233_v12 = vadd.f32 %v232_v11, %v223_v10 }
  0xd7   : > { %235 = vst.msk [vmem:[#allocation2] sm:$0xf] %vm234_vm2, %v233_v12 }
  0xd8   : > { %v241_v14 = vpop.xlane.xlu0 %240 }
  0xd9   : > { %v242_v15 = vmax.f32 %v236_v13, %v241_v14 }
  0xdb   : > { %243 = vst.msk [vmem:[#allocation3] sm:$0xf] %vm234_vm2, %v242_v15 }
  0xdc PF: > { %246 = sbr.rel (%p563_p1) target bundleno = 905 (0x389), region = 48  ;;  %s862_s29 = smov (!%p563_p1), 1  }
  0xe1   : > { %v863_v17 = vmov 0.0   ;;  %vm864_vm3 = vmmov 0   ;;  %v247_v18 = vld [vmem:[#allocation2] sm:$0xf]  ;;  %vm254_vm4 = vcmask 7168   ;;  %vm261_vm5 = vcmask 1043456  }
  0xe2   : > { %v249_v16 = vld [vmem:[#allocation3] sm:$0xf]  ;;  %584 = vmatprep.subr.mxu0 %v863_v17  ;;  %586 = vmatprep.mubr.msk.f32.mxu0 %vm864_vm3, %v863_v17  ;;  %v248_v19 = vmul.f32 0.00390625, %v247_v18  ;;  %v256_v21 = vld [vmem:[%s1098_s1] sm:$0x3]  ;;  %vm257_vm6 = vcmask 31744  }
  0xe3   : > { %251 = vrot.lane.b32.xlu0 %v249_v16, %s862_s29  ;;  %589 = vmatprep.subr.mxu1 %v863_v17  ;;  %vm341_vm7 = vcmask 1041408   ;;  %v336_v25 = vld [vmem:[%s1099_s2] sm:$0xf]  ;;  %vm337_vm8 = vcmask 15360   ;;  %vm415_vm9 = vcmask 11264   ;;  %vm425_vm10 = vcmask 3072  }
  0xe4   : > { %591 = vmatprep.mubr.msk.f32.mxu1 %vm864_vm3, %v863_v17 }
 0x155   : > { %v252_v20 = vpop.permute.xlu0 %251 }
 0x156   : > { %v255_v22 = vsel %vm254_vm4, %v248_v19, %v252_v20 }
 0x157   : > { %585 = vmatpush3.msk.msra.mxu0 %vm261_vm5, %v255_v22 }
 0x158   : > { %587 = vmatmul.mubr.msk.f32.vlgmr.msra.gmra.mxu0 %vm257_vm6, %v256_v21 }
 0x218   : > { %v331_v23 = vpop.f32.mrf.mxu0 }
 0x219   : > { %v335_v24 = vmax.f32 %v331_v23, 0.0 }
 0x21a   : > { %v588_v26 = vpop.f32.mrf.mxu0 }
 0x21b   : > { %590 = vmatpush3.msk.msra.mxu1 %vm341_vm7, %v335_v24 }
 0x21c   : > { %592 = vmatmul.mubr.msk.f32.vlgmr.msra.gmra.mxu1 %vm337_vm8, %v336_v25 }
 0x2dc   : > { %v411_v27 = vpop.f32.mrf.mxu1 }
 0x2dd   : > { %v416_v28 = vsel %vm415_vm9, %v411_v27, 0.0 }
 0x2de   : > { %417 = vadd.xlane.f32.xlu0 %v416_v28  ;;  %v593_v29 = vpop.f32.mrf.mxu1 }
 0x367   : > { %v418_v30 = vpop.xlane.xlu0 %417 }
 0x368   : > { %v570_v31 = vmul.f32 -1.442695, %v418_v30 }
 0x36a   : > { %704 = vpow2.f32 %v570_v31 }
 0x377   : > { %v705_v32 = vpop.eup %704 }
 0x378   : > { %v422_v33 = vadd.f32 1.0, %v705_v32 }
 0x37a   : > { %706 = vrcp.f32 %v422_v33 }
 0x387   : > { %v707_v34 = vpop.eup %706 }
 0x388   : > { %426 = vst.msk [vmem:[#allocation4] sm:$0xf] %vm425_vm10, %v707_v34 }
 0x389 PF: > { %p571_p2 = scmp.lt.s32.totalorder %s841_s18, 1 }
 0x38b   : > { %430 = sbr.rel (%p571_p2) target bundleno = 1043 (0x413), region = 52 }
 0x390   : > { %v432_v35 = vld [vmem:[#allocation4] sm:$0xf]  ;;  %v865_v36 = vmov 0   ;;  %v866_v37 = vmov 839922192   ;;  %v440_v39 = vlaneseq  ;;  %v431_v44 = vld [vmem:[%s184_s25] sm:$0xff] }
 0x391   : > { %708 = vset.pattern.permute.xlu0 %v865_v36  ;;  %v438_v38 = vunpack.c.l.s4 %v866_v37 }
 0x392   : > { %435 = vperm.xlu0 %708, %v432_v35   ;;  %v441_v41 = vshrl.u32 %v440_v39, 7 }
 0x393   : > { %v439_v40 = vunpack.c.0.s8 %v438_v38 }
 0x395   : > { %v442_v42 = vsub.s32 %v439_v40, %v441_v41 }
 0x40d   : > { %v436_v43 = vpop.permute.xlu0 %435 }
 0x40e   : > { %v443_v45 = vrot.slane %v436_v43, %v442_v42 }
 0x410   : > { %v445_v46 = vmul.f32 %v443_v45, %v431_v44 }
 0x412   : > { %446 = vst [vmem:[%s206_s30] sm:$0xff] %v445_v46 }
 0x413 PF: > { %s573_s10 = sadd.s32 4294967295, %s841_s18  ;;  %s575_s28 = sshll.u32 %s845_s19, 1 }
 0x414   : > { %p456_p4 = scmp.gt.s32.totalorder %s573_s10, 0  ;;  %s467_s27 = sshll.u32 %s206_s30, 4  ;;  %s468_s27 = int_to_ptr.vmem [resolvable:$true] %s467_s27 }
 0x415   : > { %s448_s11 = scalar_lea.sflag [#allocation7], %s204_s26  ;;  %s737_s0 = scalar_lea.vmem %s468_s27, 128 }
 0x416   : > { %s1131_s10 = smov (!%p456_p4, %s573_s10), 0  ;;  %p738_p5 = scmp.ne.s32.totalorder %s468_s27, %s737_s0 }
 0x417   : > { %s574_s29 = sshll.u32 %s1131_s10, 1  ;;  %s867_s18 = smov [#allocation8]  }
 0x418   : > { %s463_s24 = sadd.s32 %s575_s28, %s574_s29  ;;  %p739_p6 = pnand %p738_p5, %p973_p12 }
 0x419   : > { %s576_s9 = sshll.u32 %s463_s24, 6  ;;  %s741_s19 = sshll.u32 %s867_s18, 4  ;;  %s742_s19 = int_to_ptr.vmem [resolvable:$false] %s741_s19 }
 0x41a   : > { %s465_s15 = scalar_lea.hbm %s1100_s3, %s576_s9  ;;  %p740_p8 = pneg %p739_p6 }
 0x41b   : > { %s743_s23 = scalar_lea.vmem %s742_s19, 256  ;;  %p744_p9 = scmp.lt.s32.totalorder %s468_s27, %s742_s19 }
 0x41c   : > { %p745_p10 = scmp.lt.s32.totalorder %s743_s23, %s737_s0 }
 0x41e   : > { %p746_p11 = por %p745_p10, %p744_p9 }
 0x420   : > { %p747_p13 = pnand %p746_p11, %p740_p8 }
 0x422   : > { %750 = shalt.err (!%p747_p13)
}
 0x423   : > { %s751_s30 = scalar_lea.hbm %s465_s15, 128  ;;  %s755_s28 = scalar_lea.hbm %s1100_s3, 256 }
 0x424   : > { %p752_p3 = scmp.ne.s32.totalorder %s465_s15, %s751_s30  ;;  %p756_p7 = scmp.lt.s32.totalorder %s465_s15, %s1100_s3 }
 0x425   : > { %p757_p2 = scmp.lt.s32.totalorder %s755_s28, %s751_s30 }
 0x426   : > { %p753_p0 = pnand %p752_p3, %p973_p12 }
 0x427   : > { %p758_p4 = por %p757_p2, %p756_p7 }
 0x428   : > { %p754_p1 = pneg %p753_p0 }
 0x42a   : > { %p759_p5 = pnand %p758_p4, %p754_p1 }
 0x42c   : > { %762 = shalt.err (!%p759_p5)
}
 0x42d   : > { %596 = dma.vmem_to_hbm [thread:$0]  (%p973_p12), %s468_s27, 128, %s465_s15, %s448_s11  }
 0x42e PF: > { %p607_p6 = scmp.ge.s32.totalorder %s857_s22, 2  ;;  %s479_s0 = sand.u32 1, %s817_s12  }
 0x42f   : > { %p1111_p8 = scmp.ne.s32.totalorder %s1108_s8, 0  ;;  %s480_s9 = scalar_lea.sflag [#allocation7], %s479_s0 }
 0x431   : > { %p603_p9 = pnand %p607_p6, %p1111_p8 }
 0x433   : > { %p604_p10 = pneg %p603_p9 }
 0x435   : > { %812 = dma.done.wait (%p604_p10), %s480_s9, 128  }
 0x436   : > { %814 = vsyncadd (%p604_p10), %s480_s9, 4294967168  ;;  %s19_s22 = sadd.s32 1, %s857_s22   ;;  %s1112_s6 = sld [smem:[#allocation11_spill]] }
 0x437   : > { %p16_p11 = scmp.ge.s32.totalorder %s19_s22, 6   ;;  %s1113_s27 = sld [smem:[#allocation12_spill]] }
 0x438   : > { %s1114_s12 = smov %s821_s13  ;;  %s1115_s13 = smov %s825_s14 }
 0x439   : > { %s1116_s14 = smov %s979_s7  ;;  %s1117_s15 = smov %s833_s16 }
 0x43a   : > { %s1118_s16 = smov %s837_s17  ;;  %s1119_s17 = smov %s967_s5 }
 0x43b   : > { %s1120_s18 = smov %s849_s20  ;;  %s1121_s19 = smov %s853_s21 }
 0x43c   : > { %s1122_s20 = smov %s1112_s6  ;;  %18 = sbr.rel (!%p16_p11) target bundleno = 11 (0xb), region = 93 }
 0x43d   : > { %s1123_s21 = smov %s1113_s27 }
 0x441   :  { %485 = vsyncpa [#allocation6], 1 }
 0x442   :  { %487 = vsyncpa [#allocation6 + $0x1], 1 }
 0x443   :  { %488 = vsyncpa [#allocation7], 1 }
 0x444   :  { %490 = vsyncpa [#allocation7 + $0x1], 1 }

</bundles_post_ra>
